<compile_context>
chip_gen: v7x
topology: tpu7x:2x2x1
jax: 0.10.0
libtpu: 0.0.40
codegen_flags: <defaults>
</compile_context>

<pallas_src>
import jax
import jax.numpy as jnp
from jax.experimental import pallas as pl
from jax.experimental.pallas import tpu as pltpu


def _round_up(v, m):
    return (v + m - 1) // m * m


def _make_elman_kernel(T, BP, HP, CHUNK):
    """Builds the kernel with static time / padding parameters baked in."""
    n_full = T // CHUNK
    rem = T - n_full * CHUNK

    def kernel(x_ref, w1x_ref, w1h_ref, b1_ref, w2_ref, b2_ref,
               out_ref, hfinal_ref, xw_ref):
        # x_ref:      (T*BP, EP)   time-major, batch/lane padded input
        # w1x_ref:    (EP, HP)     x-part of lin1 weight (input-major)
        # w1h_ref:    (HP, HP)     h-part of lin1 weight (input-major)
        # b1_ref:     (1, HP)
        # w2_ref:     (HP, OP)     lin2 weight (input-major)
        # b2_ref:     (1, OP)
        # out_ref:    (T*BP, OP)
        # hfinal_ref: (BP, HP)
        # xw_ref:     (T*BP, HP)   scratch; holds X@W1x+b1, overwritten by h_t in place

        # Phase 1: hoisted input projection for all timesteps, bias folded in.
        xw_ref[...] = (
            jnp.dot(x_ref[...], w1x_ref[...], preferred_element_type=jnp.float32)
            + b1_ref[...])

        w1h = w1h_ref[...]
        w2 = w2_ref[...]
        b2 = b2_ref[...]

        def recur_steps(base_off, n_steps, h0):
            # n_steps of the recurrence starting at row offset base_off; each
            # h_t is written back into xw_ref in place (scratch reuse).
            def step(s, h):
                off = pl.multiple_of(base_off + s * BP, BP)
                pre = xw_ref[pl.ds(off, BP), :] + jnp.dot(
                    h, w1h, preferred_element_type=jnp.float32)
                h_new = jnp.maximum(pre, 0.0)
                xw_ref[pl.ds(off, BP), :] = h_new
                return h_new
            # bounded unroll: n_steps <= CHUNK <= 8
            return jax.lax.fori_loop(0, n_steps, step, h0, unroll=True)

        def project_chunk(base_off, n_rows):
            # Phase-3 output projection for the rows whose h is already in xw_ref.
            out_ref[pl.ds(base_off, n_rows), :] = (
                jnp.dot(xw_ref[pl.ds(base_off, n_rows), :], w2,
                        preferred_element_type=jnp.float32) + b2)

        h = jnp.zeros((BP, HP), jnp.float32)

        if n_full > 0:
            CROWS = CHUNK * BP

            def chunk_body(c, h):
                base = pl.multiple_of(c * CROWS, BP)
                h = recur_steps(base, CHUNK, h)
                project_chunk(base, CROWS)          # interleaved with recurrence
                return h

            h = jax.lax.fori_loop(0, n_full, chunk_body, h)

        if rem > 0:
            base = n_full * CHUNK * BP
            h = recur_steps(base, rem, h)
            project_chunk(base, rem * BP)

        # Final hidden written exactly once.
        hfinal_ref[...] = h

    return kernel


def elman_forward(x, w1, b1, w2, b2):
    """x: (b, t, e) float32.
    w1: (hsize, insize + hsize), b1: (hsize,), w2: (outsize, hsize), b2: (outsize,)
    (PyTorch nn.Linear conventions).  Returns (outs (b,t,outsize), hidden (b,hsize))."""
    b, t, e = x.shape
    hsize = w1.shape[0]
    outsize = w2.shape[0]

    # Hardware-tile padding: sublanes -> 8, lanes -> 128.
    BP = _round_up(max(b, 8), 8)
    EP = _round_up(e, 128)
    HP = _round_up(hsize, 128)
    OP = _round_up(outsize, 128)
    CHUNK = min(t, 8)

    f32 = jnp.float32

    # Split lin1 into x-part and h-part, pre-transpose to input-major, zero-pad.
    w1_t = w1.T.astype(f32)                      # (e + hsize, hsize)
    w1x_p = jnp.zeros((EP, HP), f32).at[:e, :hsize].set(w1_t[:e, :])
    w1h_p = jnp.zeros((HP, HP), f32).at[:hsize, :hsize].set(w1_t[e:, :])
    b1_p = jnp.zeros((1, HP), f32).at[0, :hsize].set(b1.astype(f32))
    w2_p = jnp.zeros((HP, OP), f32).at[:hsize, :outsize].set(w2.T.astype(f32))
    b2_p = jnp.zeros((1, OP), f32).at[0, :outsize].set(b2.astype(f32))

    # Time-major, padded, flattened input: (t, b, e) -> (t*BP, EP).
    # TODO(synk): for large inputs this transpose/pad is an extra HBM pass; a
    # chunked variant would DMA the raw (b,t,e) tensor and pad in VMEM instead.
    x_tm = jnp.transpose(x.astype(f32), (1, 0, 2))           # (t, b, e)
    x_p = jnp.pad(x_tm, ((0, 0), (0, BP - b), (0, EP - e)))  # (t, BP, EP)
    x_flat = x_p.reshape(t * BP, EP)

    # VMEM budget (single-buffered, gridless) with margin; cost estimate for XLA.
    itemsize = 4
    resident = (t * BP * EP + EP * HP + HP * HP + 8 * HP + HP * OP + 8 * OP
                + t * BP * OP + BP * HP + t * BP * HP) * itemsize
    vmem_limit = int(min(max(2 * resident + (2 << 20), 32 << 20), 100 << 20))
    flops = 2 * t * BP * (EP * HP + HP * HP + HP * OP)
    bytes_accessed = (t * BP * (EP + OP) + EP * HP + HP * HP + HP * OP
                      + 2 * HP + 2 * OP + BP * HP) * itemsize

    vmem = pltpu.MemorySpace.VMEM
    out_flat, h_final_p = pl.pallas_call(
        _make_elman_kernel(t, BP, HP, CHUNK),
        out_shape=(jax.ShapeDtypeStruct((t * BP, OP), f32),
                   jax.ShapeDtypeStruct((BP, HP), f32)),
        in_specs=[pl.BlockSpec(memory_space=vmem)] * 6,
        out_specs=(pl.BlockSpec(memory_space=vmem),
                   pl.BlockSpec(memory_space=vmem)),
        scratch_shapes=[pltpu.VMEM((t * BP, HP), f32)],   # xw / h (reused in place)
        compiler_params=pltpu.CompilerParams(vmem_limit_bytes=vmem_limit),
        cost_estimate=pl.CostEstimate(flops=flops, transcendentals=0,
                                      bytes_accessed=bytes_accessed),
    )(x_flat, w1x_p, w1h_p, b1_p, w2_p, b2_p)

    # Crop padding and restore (b, t, outsize) layout in the wrapper.
    outs = jnp.transpose(
        out_flat.reshape(t, BP, OP)[:, :b, :outsize], (1, 0, 2))
    h_final = h_final_p[:b, :hsize]
    return outs, h_final


def elman_reference(x, w1, b1, w2, b2):
    """Pure-JAX reference matching the PyTorch forward exactly."""
    b, t, e = x.shape
    hsize = w1.shape[0]
    hidden = jnp.zeros((b, hsize), jnp.float32)
    outs = []
    for i in range(t):
        inp = jnp.concatenate([x[:, i, :], hidden], axis=1)
        hidden = jax.nn.relu(inp @ w1.T + b1)
        outs.append((hidden @ w2.T + b2)[:, None, :])
    return jnp.concatenate(outs, axis=1), hidden


if __name__ == "__main__":
    # Small shapes consistent with the module: emb = insize = hsize = outsize so
    # the zero hidden matches lin1's expected input width (as in the PyTorch code).
    vocab_size = 100
    emb = insize = hsize = outsize = 32
    batch, seq = 2, 8

    key = jax.random.PRNGKey(0)
    kx, k1w, k1b, k2w, k2b, kemb = jax.random.split(key, 6)

    w1 = jax.random.normal(k1w, (hsize, insize + hsize), jnp.float32) * 0.1
    b1 = jax.random.normal(k1b, (hsize,), jnp.float32) * 0.1
    w2 = jax.random.normal(k2w, (outsize, hsize), jnp.float32) * 0.1
    b2 = jax.random.normal(k2b, (outsize,), jnp.float32) * 0.1
    # TODO(synk): nn.Embedding weights defined but unused — the module's forward
    # consumes already-embedded float inputs, so the table never enters the kernel.
    emb_table = jax.random.normal(kemb, (vocab_size, emb), jnp.float32)

    x = jax.random.normal(kx, (batch, seq, emb), jnp.float32)

    outs, h_final = elman_forward(x, w1, b1, w2, b2)
    jax.block_until_ready((outs, h_final))

    ref_outs, ref_h = elman_reference(x, w1, b1, w2, b2)
    assert outs.shape == (batch, seq, outsize)
    assert h_final.shape == (batch, hsize)
    assert jnp.allclose(outs, ref_outs, atol=1e-5, rtol=1e-5)
    assert jnp.allclose(h_final, ref_h, atol=1e-5, rtol=1e-5)

    print("KERNEL_OK")
</pallas_src>

<mosaic_0001>
module attributes {stable_mosaic.version = 11 : i64} {
  func.func @kernel(%arg0: memref<64x128xf32, #tpu.memory_space<vmem>>, %arg1: memref<128x128xf32, #tpu.memory_space<vmem>>, %arg2: memref<128x128xf32, #tpu.memory_space<vmem>>, %arg3: memref<1x128xf32, #tpu.memory_space<vmem>>, %arg4: memref<128x128xf32, #tpu.memory_space<vmem>>, %arg5: memref<1x128xf32, #tpu.memory_space<vmem>>, %arg6: memref<64x128xf32, #tpu.memory_space<vmem>>, %arg7: memref<8x128xf32, #tpu.memory_space<vmem>>, %arg8: memref<64x128xf32, #tpu.memory_space<vmem>>) attributes {dimension_semantics = [], scalar_prefetch = 0 : i64, scratch_operands = 1 : i64, tpu.core_type = #tpu.core_type<tc>} {
    %c0 = arith.constant 0 : index
    %c0_0 = arith.constant 0 : index
    %0 = vector.load %arg0[%c0, %c0_0] : memref<64x128xf32, #tpu.memory_space<vmem>>, vector<64x128xf32>
    %c0_1 = arith.constant 0 : index
    %c0_2 = arith.constant 0 : index
    %1 = vector.load %arg1[%c0_1, %c0_2] : memref<128x128xf32, #tpu.memory_space<vmem>>, vector<128x128xf32>
    %cst = arith.constant dense<0.000000e+00> : vector<64x128xf32>
    %2 = tpu.matmul %0, %1, %cst {dimension_numbers = #tpu.dot_dimension_numbers<[1], [0], [0], [1], [0, 0, 1, 1], [], []>} : vector<64x128xf32>, vector<128x128xf32>, vector<64x128xf32> -> vector<64x128xf32>
    %c0_3 = arith.constant 0 : index
    %c0_4 = arith.constant 0 : index
    %3 = vector.load %arg3[%c0_3, %c0_4] : memref<1x128xf32, #tpu.memory_space<vmem>>, vector<1x128xf32>
    %4 = vector.broadcast %3 : vector<1x128xf32> to vector<64x128xf32>
    %5 = arith.addf %2, %4 : vector<64x128xf32>
    %c0_5 = arith.constant 0 : index
    %c0_6 = arith.constant 0 : index
    %6 = vector.load %arg8[%c0_5, %c0_6] : memref<64x128xf32, #tpu.memory_space<vmem>>, vector<64x128xf32>
    tpu.vector_store %arg8[%c0_5, %c0_6], %5 {strides = array<i32>} : memref<64x128xf32, #tpu.memory_space<vmem>>, vector<64x128xf32>,
    %c0_7 = arith.constant 0 : index
    %c0_8 = arith.constant 0 : index
    %7 = vector.load %arg2[%c0_7, %c0_8] : memref<128x128xf32, #tpu.memory_space<vmem>>, vector<128x128xf32>
    %c0_9 = arith.constant 0 : index
    %c0_10 = arith.constant 0 : index
    %8 = vector.load %arg4[%c0_9, %c0_10] : memref<128x128xf32, #tpu.memory_space<vmem>>, vector<128x128xf32>
    %c0_11 = arith.constant 0 : index
    %c0_12 = arith.constant 0 : index
    %9 = vector.load %arg5[%c0_11, %c0_12] : memref<1x128xf32, #tpu.memory_space<vmem>>, vector<1x128xf32>
    %cst_13 = arith.constant 0.000000e+00 : f32
    %10 = vector.broadcast %cst_13 : f32 to vector<8x128xf32>
    %c0_i32 = arith.constant 0 : i32
    %c64_i32 = arith.constant 64 : i32
    %11 = arith.muli %c0_i32, %c64_i32 : i32
    %12 = tpu.assume_multiple %11, 8 : i32
    %c0_i32_14 = arith.constant 0 : i32
    %c8_i32 = arith.constant 8 : i32
    %13 = arith.muli %c0_i32_14, %c8_i32 : i32
    %14 = arith.addi %12, %13 : i32
    %15 = tpu.assume_multiple %14, 8 : i32
    %16 = arith.index_cast %15 : i32 to index
    %c0_15 = arith.constant 0 : index
    %17 = vector.load %arg8[%16, %c0_15] : memref<64x128xf32, #tpu.memory_space<vmem>>, vector<8x128xf32>
    %cst_16 = arith.constant dense<0.000000e+00> : vector<8x128xf32>
    %18 = tpu.matmul %10, %7, %cst_16 {dimension_numbers = #tpu.dot_dimension_numbers<[1], [0], [0], [1], [0, 0, 1, 1], [], []>} : vector<8x128xf32>, vector<128x128xf32>, vector<8x128xf32> -> vector<8x128xf32>
    %19 = arith.addf %17, %18 : vector<8x128xf32>
    %cst_17 = arith.constant 0.000000e+00 : f32
    %20 = vector.broadcast %cst_17 : f32 to vector<8x128xf32>
    %21 = arith.maximumf %19, %20 : vector<8x128xf32>
    %22 = arith.index_cast %15 : i32 to index
    %c0_18 = arith.constant 0 : index
    %23 = vector.load %arg8[%22, %c0_18] : memref<64x128xf32, #tpu.memory_space<vmem>>, vector<8x128xf32>
    tpu.vector_store %arg8[%22, %c0_18], %21 {strides = array<i32>} : memref<64x128xf32, #tpu.memory_space<vmem>>, vector<8x128xf32>,
    %c1_i32 = arith.constant 1 : i32
    %c8_i32_19 = arith.constant 8 : i32
    %24 = arith.muli %c1_i32, %c8_i32_19 : i32
    %25 = arith.addi %12, %24 : i32
    %26 = tpu.assume_multiple %25, 8 : i32
    %27 = arith.index_cast %26 : i32 to index
    %c0_20 = arith.constant 0 : index
    %28 = vector.load %arg8[%27, %c0_20] : memref<64x128xf32, #tpu.memory_space<vmem>>, vector<8x128xf32>
    %cst_21 = arith.constant dense<0.000000e+00> : vector<8x128xf32>
    %29 = tpu.matmul %21, %7, %cst_21 {dimension_numbers = #tpu.dot_dimension_numbers<[1], [0], [0], [1], [0, 0, 1, 1], [], []>} : vector<8x128xf32>, vector<128x128xf32>, vector<8x128xf32> -> vector<8x128xf32>
    %30 = arith.addf %28, %29 : vector<8x128xf32>
    %cst_22 = arith.constant 0.000000e+00 : f32
    %31 = vector.broadcast %cst_22 : f32 to vector<8x128xf32>
    %32 = arith.maximumf %30, %31 : vector<8x128xf32>
    %33 = arith.index_cast %26 : i32 to index
    %c0_23 = arith.constant 0 : index
    %34 = vector.load %arg8[%33, %c0_23] : memref<64x128xf32, #tpu.memory_space<vmem>>, vector<8x128xf32>
    tpu.vector_store %arg8[%33, %c0_23], %32 {strides = array<i32>} : memref<64x128xf32, #tpu.memory_space<vmem>>, vector<8x128xf32>,
    %c2_i32 = arith.constant 2 : i32
    %c8_i32_24 = arith.constant 8 : i32
    %35 = arith.muli %c2_i32, %c8_i32_24 : i32
    %36 = arith.addi %12, %35 : i32
    %37 = tpu.assume_multiple %36, 8 : i32
    %38 = arith.index_cast %37 : i32 to index
    %c0_25 = arith.constant 0 : index
    %39 = vector.load %arg8[%38, %c0_25] : memref<64x128xf32, #tpu.memory_space<vmem>>, vector<8x128xf32>
    %cst_26 = arith.constant dense<0.000000e+00> : vector<8x128xf32>
    %40 = tpu.matmul %32, %7, %cst_26 {dimension_numbers = #tpu.dot_dimension_numbers<[1], [0], [0], [1], [0, 0, 1, 1], [], []>} : vector<8x128xf32>, vector<128x128xf32>, vector<8x128xf32> -> vector<8x128xf32>
    %41 = arith.addf %39, %40 : vector<8x128xf32>
    %cst_27 = arith.constant 0.000000e+00 : f32
    %42 = vector.broadcast %cst_27 : f32 to vector<8x128xf32>
    %43 = arith.maximumf %41, %42 : vector<8x128xf32>
    %44 = arith.index_cast %37 : i32 to index
    %c0_28 = arith.constant 0 : index
    %45 = vector.load %arg8[%44, %c0_28] : memref<64x128xf32, #tpu.memory_space<vmem>>, vector<8x128xf32>
    tpu.vector_store %arg8[%44, %c0_28], %43 {strides = array<i32>} : memref<64x128xf32, #tpu.memory_space<vmem>>, vector<8x128xf32>,
    %c3_i32 = arith.constant 3 : i32
    %c8_i32_29 = arith.constant 8 : i32
    %46 = arith.muli %c3_i32, %c8_i32_29 : i32
    %47 = arith.addi %12, %46 : i32
    %48 = tpu.assume_multiple %47, 8 : i32
    %49 = arith.index_cast %48 : i32 to index
    %c0_30 = arith.constant 0 : index
    %50 = vector.load %arg8[%49, %c0_30] : memref<64x128xf32, #tpu.memory_space<vmem>>, vector<8x128xf32>
    %cst_31 = arith.constant dense<0.000000e+00> : vector<8x128xf32>
    %51 = tpu.matmul %43, %7, %cst_31 {dimension_numbers = #tpu.dot_dimension_numbers<[1], [0], [0], [1], [0, 0, 1, 1], [], []>} : vector<8x128xf32>, vector<128x128xf32>, vector<8x128xf32> -> vector<8x128xf32>
    %52 = arith.addf %50, %51 : vector<8x128xf32>
    %cst_32 = arith.constant 0.000000e+00 : f32
    %53 = vector.broadcast %cst_32 : f32 to vector<8x128xf32>
    %54 = arith.maximumf %52, %53 : vector<8x128xf32>
    %55 = arith.index_cast %48 : i32 to index
    %c0_33 = arith.constant 0 : index
    %56 = vector.load %arg8[%55, %c0_33] : memref<64x128xf32, #tpu.memory_space<vmem>>, vector<8x128xf32>
    tpu.vector_store %arg8[%55, %c0_33], %54 {strides = array<i32>} : memref<64x128xf32, #tpu.memory_space<vmem>>, vector<8x128xf32>,
    %c4_i32 = arith.constant 4 : i32
    %c8_i32_34 = arith.constant 8 : i32
    %57 = arith.muli %c4_i32, %c8_i32_34 : i32
    %58 = arith.addi %12, %57 : i32
    %59 = tpu.assume_multiple %58, 8 : i32
    %60 = arith.index_cast %59 : i32 to index
    %c0_35 = arith.constant 0 : index
    %61 = vector.load %arg8[%60, %c0_35] : memref<64x128xf32, #tpu.memory_space<vmem>>, vector<8x128xf32>
    %cst_36 = arith.constant dense<0.000000e+00> : vector<8x128xf32>
    %62 = tpu.matmul %54, %7, %cst_36 {dimension_numbers = #tpu.dot_dimension_numbers<[1], [0], [0], [1], [0, 0, 1, 1], [], []>} : vector<8x128xf32>, vector<128x128xf32>, vector<8x128xf32> -> vector<8x128xf32>
    %63 = arith.addf %61, %62 : vector<8x128xf32>
    %cst_37 = arith.constant 0.000000e+00 : f32
    %64 = vector.broadcast %cst_37 : f32 to vector<8x128xf32>
    %65 = arith.maximumf %63, %64 : vector<8x128xf32>
    %66 = arith.index_cast %59 : i32 to index
    %c0_38 = arith.constant 0 : index
    %67 = vector.load %arg8[%66, %c0_38] : memref<64x128xf32, #tpu.memory_space<vmem>>, vector<8x128xf32>
    tpu.vector_store %arg8[%66, %c0_38], %65 {strides = array<i32>} : memref<64x128xf32, #tpu.memory_space<vmem>>, vector<8x128xf32>,
    %c5_i32 = arith.constant 5 : i32
    %c8_i32_39 = arith.constant 8 : i32
    %68 = arith.muli %c5_i32, %c8_i32_39 : i32
    %69 = arith.addi %12, %68 : i32
    %70 = tpu.assume_multiple %69, 8 : i32
    %71 = arith.index_cast %70 : i32 to index
    %c0_40 = arith.constant 0 : index
    %72 = vector.load %arg8[%71, %c0_40] : memref<64x128xf32, #tpu.memory_space<vmem>>, vector<8x128xf32>
    %cst_41 = arith.constant dense<0.000000e+00> : vector<8x128xf32>
    %73 = tpu.matmul %65, %7, %cst_41 {dimension_numbers = #tpu.dot_dimension_numbers<[1], [0], [0], [1], [0, 0, 1, 1], [], []>} : vector<8x128xf32>, vector<128x128xf32>, vector<8x128xf32> -> vector<8x128xf32>
    %74 = arith.addf %72, %73 : vector<8x128xf32>
    %cst_42 = arith.constant 0.000000e+00 : f32
    %75 = vector.broadcast %cst_42 : f32 to vector<8x128xf32>
    %76 = arith.maximumf %74, %75 : vector<8x128xf32>
    %77 = arith.index_cast %70 : i32 to index
    %c0_43 = arith.constant 0 : index
    %78 = vector.load %arg8[%77, %c0_43] : memref<64x128xf32, #tpu.memory_space<vmem>>, vector<8x128xf32>
    tpu.vector_store %arg8[%77, %c0_43], %76 {strides = array<i32>} : memref<64x128xf32, #tpu.memory_space<vmem>>, vector<8x128xf32>,
    %c6_i32 = arith.constant 6 : i32
    %c8_i32_44 = arith.constant 8 : i32
    %79 = arith.muli %c6_i32, %c8_i32_44 : i32
    %80 = arith.addi %12, %79 : i32
    %81 = tpu.assume_multiple %80, 8 : i32
    %82 = arith.index_cast %81 : i32 to index
    %c0_45 = arith.constant 0 : index
    %83 = vector.load %arg8[%82, %c0_45] : memref<64x128xf32, #tpu.memory_space<vmem>>, vector<8x128xf32>
    %cst_46 = arith.constant dense<0.000000e+00> : vector<8x128xf32>
    %84 = tpu.matmul %76, %7, %cst_46 {dimension_numbers = #tpu.dot_dimension_numbers<[1], [0], [0], [1], [0, 0, 1, 1], [], []>} : vector<8x128xf32>, vector<128x128xf32>, vector<8x128xf32> -> vector<8x128xf32>
    %85 = arith.addf %83, %84 : vector<8x128xf32>
    %cst_47 = arith.constant 0.000000e+00 : f32
    %86 = vector.broadcast %cst_47 : f32 to vector<8x128xf32>
    %87 = arith.maximumf %85, %86 : vector<8x128xf32>
    %88 = arith.index_cast %81 : i32 to index
    %c0_48 = arith.constant 0 : index
    %89 = vector.load %arg8[%88, %c0_48] : memref<64x128xf32, #tpu.memory_space<vmem>>, vector<8x128xf32>
    tpu.vector_store %arg8[%88, %c0_48], %87 {strides = array<i32>} : memref<64x128xf32, #tpu.memory_space<vmem>>, vector<8x128xf32>,
    %c7_i32 = arith.constant 7 : i32
    %c8_i32_49 = arith.constant 8 : i32
    %90 = arith.muli %c7_i32, %c8_i32_49 : i32
    %91 = arith.addi %12, %90 : i32
    %92 = tpu.assume_multiple %91, 8 : i32
    %93 = arith.index_cast %92 : i32 to index
    %c0_50 = arith.constant 0 : index
    %94 = vector.load %arg8[%93, %c0_50] : memref<64x128xf32, #tpu.memory_space<vmem>>, vector<8x128xf32>
    %cst_51 = arith.constant dense<0.000000e+00> : vector<8x128xf32>
    %95 = tpu.matmul %87, %7, %cst_51 {dimension_numbers = #tpu.dot_dimension_numbers<[1], [0], [0], [1], [0, 0, 1, 1], [], []>} : vector<8x128xf32>, vector<128x128xf32>, vector<8x128xf32> -> vector<8x128xf32>
    %96 = arith.addf %94, %95 : vector<8x128xf32>
    %cst_52 = arith.constant 0.000000e+00 : f32
    %97 = vector.broadcast %cst_52 : f32 to vector<8x128xf32>
    %98 = arith.maximumf %96, %97 : vector<8x128xf32>
    %99 = arith.index_cast %92 : i32 to index
    %c0_53 = arith.constant 0 : index
    %100 = vector.load %arg8[%99, %c0_53] : memref<64x128xf32, #tpu.memory_space<vmem>>, vector<8x128xf32>
    tpu.vector_store %arg8[%99, %c0_53], %98 {strides = array<i32>} : memref<64x128xf32, #tpu.memory_space<vmem>>, vector<8x128xf32>,
    %c8_i32_54 = arith.constant 8 : i32
    %101 = arith.index_cast %12 : i32 to index
    %c0_55 = arith.constant 0 : index
    %102 = vector.load %arg8[%101, %c0_55] : memref<64x128xf32, #tpu.memory_space<vmem>>, vector<64x128xf32>
    %cst_56 = arith.constant dense<0.000000e+00> : vector<64x128xf32>
    %103 = tpu.matmul %102, %8, %cst_56 {dimension_numbers = #tpu.dot_dimension_numbers<[1], [0], [0], [1], [0, 0, 1, 1], [], []>} : vector<64x128xf32>, vector<128x128xf32>, vector<64x128xf32> -> vector<64x128xf32>
    %104 = vector.broadcast %9 : vector<1x128xf32> to vector<64x128xf32>
    %105 = arith.addf %103, %104 : vector<64x128xf32>
    %106 = arith.index_cast %12 : i32 to index
    %c0_57 = arith.constant 0 : index
    %107 = vector.load %arg6[%106, %c0_57] : memref<64x128xf32, #tpu.memory_space<vmem>>, vector<64x128xf32>
    tpu.vector_store %arg6[%106, %c0_57], %105 {strides = array<i32>} : memref<64x128xf32, #tpu.memory_space<vmem>>, vector<64x128xf32>,
    %c1_i32_58 = arith.constant 1 : i32
    %c0_59 = arith.constant 0 : index
    %c0_60 = arith.constant 0 : index
    %108 = vector.load %arg7[%c0_59, %c0_60] : memref<8x128xf32, #tpu.memory_space<vmem>>, vector<8x128xf32>
    tpu.vector_store %arg7[%c0_59, %c0_60], %98 {strides = array<i32>} : memref<8x128xf32, #tpu.memory_space<vmem>>, vector<8x128xf32>,
    return
  }
}

</mosaic_0001>

<bundles_post_ra>
// kernel: tpu_custom_call.1
= control target key start
LH: loop header
LB: loop body
LE: loop exit
PB: predicated region body
PF: predicated region fallthrough
CT: control target
= control target key end

     0   :  { %13 = vsyncpa [#allocation4], 0  ;;  %s2375_s0 = inlined_call_operand.hbm [shape: f32[64,128], index: 0, kind: input, shape index: {}]   ;;  %s2376_s1 = inlined_call_operand.hbm [shape: f32[128,128], index: 1, kind: input, shape index: {}]   ;;  %s2377_s2 = inlined_call_operand.hbm [shape: f32[128,128], index: 2, kind: input, shape index: {}]   ;;  %s2378_s3 = inlined_call_operand.vmem [shape: f32[1,128], index: 3, kind: input, shape index: {}]   ;;  %s2379_s4 = inlined_call_operand.hbm [shape: f32[128,128], index: 4, kind: input, shape index: {}]   ;;  %s2380_s5 = inlined_call_operand.vmem [shape: f32[1,128], index: 5, kind: input, shape index: {}]   ;;  %s2381_s6 = inlined_call_operand.hbm [shape: f32[64,128], index: 6, kind: output, shape index: {0}]   ;;  %s2382_s7 = inlined_call_operand.hbm [shape: f32[8,128], index: 7, kind: output, shape index: {1}]  }
   0x1   :  { %14 = vsyncpa [#allocation7], 0 }
   0x2   :  { %15 = vsyncpa [#allocation10], 0 }
   0x3   :  { %16 = vsyncpa [#allocation5], 0 }
   0x4   :  { %17 = vsyncpa [#allocation13], 0  ;;  %s1996_s24 = smov [#allocation6]   ;;  %s1997_s26 = smov [#allocation3]  }
   0x5   :  { %s35_s25 = sshll.u32 %s1996_s24, 4  ;;  %s23_s27 = sshll.u32 %s1997_s26, 4  ;;  %s36_s25 = int_to_ptr.vmem [resolvable:$true] %s35_s25  ;;  %s2047_s27 = int_to_ptr.vmem [resolvable:$true] %s23_s27 }
   0x6   :  { %s1854_s30 = scalar_lea.hbm %s2376_s1, 2048 }
   0x7   :  { %p1855_p0 = scmp.ne.s32.totalorder %s2376_s1, %s1854_s30  ;;  %p1858_p1 = scmp.lt.u32.totalorder %s1854_s30, %s2376_s1 }
   0x9   :  { %p1860_p2 = pnand %p1858_p1, %p1855_p0 }
   0xb   :  { %1863 = shalt.err (!%p1860_p2)
}
   0xc   :  { %s1864_s12 = scalar_lea.vmem %s36_s25, 2048  ;;  %p1869_p4 = scmp.lt.s32.totalorder %s36_s25, %s36_s25 }
   0xd   :  { %p1865_p3 = scmp.ne.s32.totalorder %s36_s25, %s1864_s12  ;;  %p1870_p5 = scmp.lt.s32.totalorder %s1864_s12, %s1864_s12 }
   0xf   :  { %p1871_p6 = por %p1870_p5, %p1869_p4 }
  0x11   :  { %p1872_p7 = pnand %p1871_p6, %p1865_p3 }
  0x13   :  { %1875 = shalt.err (!%p1872_p7)
}
  0x14   :  { %s1998_s13 = smov 128   ;;  %s1999_s14 = smov 8  }
  0x15   :  { %41 = dma.hbm_to_vmem [thread:$0]  %s2376_s1, 2048, %s36_s25, [#allocation7], %s1998_s13, %s1998_s13, %s1999_s14  }
  0x16   :  { %s1876_s19 = scalar_lea.hbm %s2375_s0, 1024 }
  0x17   :  { %p1877_p8 = scmp.ne.s32.totalorder %s2375_s0, %s1876_s19  ;;  %p1880_p9 = scmp.lt.u32.totalorder %s1876_s19, %s2375_s0 }
  0x19   :  { %p1882_p10 = pnand %p1880_p9, %p1877_p8 }
  0x1b   :  { %1885 = shalt.err (!%p1882_p10)
}
  0x1c   :  { %s1886_s24 = scalar_lea.vmem %s2047_s27, 1024  ;;  %p1891_p12 = scmp.lt.s32.totalorder %s2047_s27, %s2047_s27 }
  0x1d   :  { %p1887_p11 = scmp.ne.s32.totalorder %s2047_s27, %s1886_s24  ;;  %p1892_p13 = scmp.lt.s32.totalorder %s1886_s24, %s1886_s24 }
  0x1f   :  { %p1893_p0 = por %p1892_p13, %p1891_p12 }
  0x21   :  { %p1894_p1 = pnand %p1893_p0, %p1887_p11 }
  0x23   :  { %1897 = shalt.err (!%p1894_p1)
}
  0x24   :  { %29 = dma.hbm_to_vmem [thread:$0]  %s2375_s0, 1024, %s2047_s27, [#allocation4], %s1998_s13, %s1998_s13, %s1999_s14  }
  0x25   :  { %s2000_s26 = smov [#allocation8]   ;;  %s2001_s29 = smov [#allocation9]  }
  0x26   :  { %s47_s28 = sshll.u32 %s2000_s26, 4  ;;  %s61_s30 = sshll.u32 %s2001_s29, 4  ;;  %s48_s28 = int_to_ptr.vmem [resolvable:$true] %s47_s28  ;;  %s2084_s30 = int_to_ptr.vmem [resolvable:$true] %s61_s30 }
  0x27   :  { %s1898_s10 = scalar_lea.hbm %s2377_s2, 2048 }
  0x28   :  { %p1899_p2 = scmp.ne.s32.totalorder %s2377_s2, %s1898_s10  ;;  %p1902_p3 = scmp.lt.u32.totalorder %s1898_s10, %s2377_s2 }
  0x2a   :  { %p1904_p4 = pnand %p1902_p3, %p1899_p2 }
  0x2c   :  { %1907 = shalt.err (!%p1904_p4)
}
  0x2d   :  { %s1908_s0 = scalar_lea.vmem %s48_s28, 2048  ;;  %p1913_p6 = scmp.lt.s32.totalorder %s48_s28, %s48_s28 }
  0x2e   :  { %p1909_p5 = scmp.ne.s32.totalorder %s48_s28, %s1908_s0  ;;  %p1914_p7 = scmp.lt.s32.totalorder %s1908_s0, %s1908_s0 }
  0x30   :  { %p1915_p8 = por %p1914_p7, %p1913_p6 }
  0x32   :  { %p1916_p9 = pnand %p1915_p8, %p1909_p5 }
  0x34   :  { %1919 = shalt.err (!%p1916_p9)
}
  0x35   :  { %53 = dma.hbm_to_vmem [thread:$0]  %s2377_s2, 2048, %s48_s28, [#allocation7], %s1998_s13, %s1998_s13, %s1999_s14  }
  0x36   :  { %s1920_s20 = scalar_lea.hbm %s2379_s4, 2048 }
  0x37   :  { %p1921_p10 = scmp.ne.s32.totalorder %s2379_s4, %s1920_s20  ;;  %p1924_p11 = scmp.lt.u32.totalorder %s1920_s20, %s2379_s4 }
  0x39   :  { %p1926_p12 = pnand %p1924_p11, %p1921_p10 }
  0x3b   :  { %1929 = shalt.err (!%p1926_p12)
}
  0x3c   :  { %s1930_s1 = scalar_lea.vmem %s2084_s30, 2048  ;;  %p1935_p0 = scmp.lt.s32.totalorder %s2084_s30, %s2084_s30 }
  0x3d   :  { %p1931_p13 = scmp.ne.s32.totalorder %s2084_s30, %s1930_s1  ;;  %p1936_p1 = scmp.lt.s32.totalorder %s1930_s1, %s1930_s1 }
  0x3f   :  { %p1937_p2 = por %p1936_p1, %p1935_p0 }
  0x41   :  { %p1938_p3 = pnand %p1937_p2, %p1931_p13 }
  0x43   :  { %1941 = shalt.err (!%p1938_p3)
}
  0x44   :  { %67 = dma.hbm_to_vmem [thread:$0]  %s2379_s4, 2048, %s2084_s30, [#allocation10], %s1998_s13, %s1998_s13, %s1999_s14  }
  0x45   :  { %1986 = dma.done.wait [#allocation4], 1024  }
  0x46   :  { %1987 = vsyncadd [#allocation4], 4294966272 }
  0x47   :  { %1988 = dma.done.wait [#allocation7], 4096  }
  0x48   :  { %1989 = vsyncadd [#allocation7], 4294963200 }
  0x49   :  { %1990 = dma.done.wait [#allocation10], 2048  }
  0x4a   :  { %1991 = vsyncadd [#allocation10], 4294965248  ;;  %v2002_v0 = vmov 0.0|0.0   ;;  %vm2003_vm0 = vmmov 0   ;;  %v2004_v1 = vmov 0.0   ;;  %v90_v2 = vld [vmem:[#allocation6] sm:$0xff] }
  0x4b   :  { %1619 = vmatprep.subr.bf16.mxu1 %v2002_v0  ;;  %1295 = vmatprep.mubr.msk.f32.mxu1 %vm2003_vm0, %v2004_v1  ;;  %v91_v3 = vld [vmem:[#allocation6 + $0x8] sm:$0xff]  ;;  %v226_v4 = vld [vmem:[#allocation8] sm:$0xff]  ;;  %v92_v7 = vld [vmem:[#allocation6 + $0x10] sm:$0xff] }
  0x4c   :  { %v1587_v5 = vpack.c.bf16 %v91_v3, %v90_v2  ;;  %v227_v6 = vld [vmem:[#allocation8 + $0x8] sm:$0xff]  ;;  %v93_v8 = vld [vmem:[#allocation6 + $0x18] sm:$0xff]  ;;  %v228_v11 = vld [vmem:[#allocation8 + $0x10] sm:$0xff] }
  0x4d   :  { %v2124_v9 = vpack.c.bf16 %v227_v6, %v226_v4  ;;  %v1591_v10 = vpack.c.bf16 %v93_v8, %v92_v7  ;;  %v229_v12 = vld [vmem:[#allocation8 + $0x18] sm:$0xff]  ;;  %v94_v13 = vld [vmem:[#allocation6 + $0x20] sm:$0xff]  ;;  %v95_v14 = vld [vmem:[#allocation6 + $0x28] sm:$0xff] }
  0x4e   :  { %1588 = vmatprep.subr.bf16.mxu0 %v1587_v5  ;;  %v2127_v15 = vpack.c.bf16 %v229_v12, %v228_v11  ;;  %v1595_v16 = vpack.c.bf16 %v95_v14, %v94_v13  ;;  %v230_v17 = vld [vmem:[#allocation8 + $0x20] sm:$0xff]  ;;  %v231_v18 = vld [vmem:[#allocation8 + $0x28] sm:$0xff]  ;;  %v96_v19 = vld [vmem:[#allocation6 + $0x30] sm:$0xff] }
  0x4f   :  { %1590 = vmatpush3.bf16.msra.mxu0 %v1587_v5  ;;  %1621 = vmatpush3.bf16.msra.mxu1 %v2124_v9  ;;  %v97_v20 = vld [vmem:[#allocation6 + $0x38] sm:$0xff]  ;;  %v2131_v21 = vpack.c.bf16 %v231_v18, %v230_v17  ;;  %v232_v23 = vld [vmem:[#allocation8 + $0x30] sm:$0xff]  ;;  %v98_v25 = vld [vmem:[#allocation6 + $0x40] sm:$0xff] }
  0x50   :  { %1592 = vmatprep.subr.bf16.mxu0 %v1591_v10  ;;  %1622 = vmatprep.subr.bf16.mxu1 %v2002_v0  ;;  %v1599_v22 = vpack.c.bf16 %v97_v20, %v96_v19  ;;  %v233_v24 = vld [vmem:[#allocation8 + $0x38] sm:$0xff]  ;;  %v99_v26 = vld [vmem:[#allocation6 + $0x48] sm:$0xff]  ;;  %v82_v27 = vld [vmem:[#allocation3] sm:$0xff] }
  0x51   :  { %1251 = vmatprep.mubr.f32.mxu0 %v82_v27  ;;  %v2135_v28 = vpack.c.bf16 %v233_v24, %v232_v23  ;;  %v1603_v29 = vpack.c.bf16 %v99_v26, %v98_v25  ;;  %v234_v30 = vld [vmem:[#allocation8 + $0x40] sm:$0xff]  ;;  %v235_v31 = vld [vmem:[#allocation8 + $0x48] sm:$0xff]  ;;  %v100_v32 = vld [vmem:[#allocation6 + $0x50] sm:$0xff] }
  0x52   :  { %v101_v33 = vld [vmem:[#allocation6 + $0x58] sm:$0xff]  ;;  %v2139_v34 = vpack.c.bf16 %v235_v31, %v234_v30  ;;  %v236_v36 = vld [vmem:[#allocation8 + $0x50] sm:$0xff]  ;;  %v102_v38 = vld [vmem:[#allocation6 + $0x60] sm:$0xff] }
  0x53   :  { %1594 = vmatpush3.bf16.msra.mxu0 %v1591_v10  ;;  %1624 = vmatpush3.bf16.msra.mxu1 %v2127_v15  ;;  %v1607_v35 = vpack.c.bf16 %v101_v33, %v100_v32  ;;  %v237_v37 = vld [vmem:[#allocation8 + $0x58] sm:$0xff]  ;;  %v103_v39 = vld [vmem:[#allocation6 + $0x68] sm:$0xff]  ;;  %v238_v42 = vld [vmem:[#allocation8 + $0x60] sm:$0xff] }
  0x54   :  { %1596 = vmatprep.subr.bf16.mxu0 %v1595_v16  ;;  %1625 = vmatprep.subr.bf16.mxu1 %v2002_v0  ;;  %v2143_v40 = vpack.c.bf16 %v237_v37, %v236_v36  ;;  %v1611_v41 = vpack.c.bf16 %v103_v39, %v102_v38  ;;  %v239_v43 = vld [vmem:[#allocation8 + $0x68] sm:$0xff]  ;;  %v104_v44 = vld [vmem:[#allocation6 + $0x70] sm:$0xff]  ;;  %v105_v45 = vld [vmem:[#allocation6 + $0x78] sm:$0xff] }
  0x55   :  { %v2147_v46 = vpack.c.bf16 %v239_v43, %v238_v42  ;;  %v1615_v47 = vpack.c.bf16 %v105_v45, %v104_v44  ;;  %v240_v48 = vld [vmem:[#allocation8 + $0x70] sm:$0xff]  ;;  %v241_v49 = vld [vmem:[#allocation8 + $0x78] sm:$0xff]  ;;  %v83_v51 = vld [vmem:[#allocation3 + $0x8] sm:$0xff] }
  0x56   :  { %v2151_v50 = vpack.c.bf16 %v241_v49, %v240_v48  ;;  %v84_v52 = vld [vmem:[#allocation3 + $0x10] sm:$0xff]  ;;  %v85_v53 = vld [vmem:[#allocation3 + $0x18] sm:$0xff]  ;;  %v86_v54 = vld [vmem:[#allocation3 + $0x20] sm:$0xff] }
  0x57   :  { %1598 = vmatpush3.bf16.msra.mxu0 %v1595_v16  ;;  %1627 = vmatpush3.bf16.msra.mxu1 %v2131_v21  ;;  %v87_v55 = vld [vmem:[#allocation3 + $0x28] sm:$0xff]  ;;  %v88_v56 = vld [vmem:[#allocation3 + $0x30] sm:$0xff]  ;;  %v89_v57 = vld [vmem:[#allocation3 + $0x38] sm:$0xff] }
  0x58   :  { %1600 = vmatprep.subr.bf16.mxu0 %v1599_v22  ;;  %1628 = vmatprep.subr.bf16.mxu1 %v2002_v0  ;;  %v2197_v58 = vld [vmem:[%s2378_s3] ss:$0 sm:$0xff]  ;;  %v248_v42 = vld [vmem:[#allocation9 + $0x30] sm:$0xff]  ;;  %v249_v43 = vld [vmem:[#allocation9 + $0x38] sm:$0xff] }
  0x59   :  { %v1823_v44 = vpack.c.bf16 %v249_v43, %v248_v42  ;;  %v250_v45 = vld [vmem:[#allocation9 + $0x40] sm:$0xff]  ;;  %v252_v48 = vld [vmem:[#allocation9 + $0x50] sm:$0xff]  ;;  %v253_v49 = vld [vmem:[#allocation9 + $0x58] sm:$0xff] }
  0x5b   :  { %1602 = vmatpush3.bf16.msra.mxu0 %v1599_v22  ;;  %1630 = vmatpush3.bf16.msra.mxu1 %v2135_v28 }
  0x5c   :  { %1604 = vmatprep.subr.bf16.mxu0 %v1603_v29  ;;  %1631 = vmatprep.subr.bf16.mxu1 %v2002_v0 }
  0x5f   :  { %1606 = vmatpush3.bf16.msra.mxu0 %v1603_v29  ;;  %1633 = vmatpush3.bf16.msra.mxu1 %v2139_v34 }
  0x60   :  { %1608 = vmatprep.subr.bf16.mxu0 %v1607_v35  ;;  %1634 = vmatprep.subr.bf16.mxu1 %v2002_v0 }
  0x63   :  { %1610 = vmatpush3.bf16.msra.mxu0 %v1607_v35  ;;  %1636 = vmatpush3.bf16.msra.mxu1 %v2143_v40  ;;  %v245_v35 = vld [vmem:[#allocation9 + $0x18] sm:$0xff] }
  0x64   :  { %1612 = vmatprep.subr.bf16.mxu0 %v1611_v41  ;;  %1637 = vmatprep.subr.bf16.mxu1 %v2002_v0 }
  0x67   :  { %1614 = vmatpush3.bf16.msra.mxu0 %v1611_v41  ;;  %1639 = vmatpush3.bf16.msra.mxu1 %v2147_v46  ;;  %v247_v41 = vld [vmem:[#allocation9 + $0x28] sm:$0xff] }
  0x68   :  { %1616 = vmatprep.subr.bf16.mxu0 %v1615_v47  ;;  %1640 = vmatprep.subr.bf16.mxu1 %v2002_v0 }
  0x6b   :  { %1618 = vmatpush3.bf16.msra.mxu0 %v1615_v47  ;;  %1642 = vmatpush3.bf16.msra.mxu1 %v2151_v50 }
  0x6c   :  { %1643 = vmatprep.subr.bf16.mxu0 %v2002_v0  ;;  %1667 = vmatprep.subr.bf16.mxu1 %v2002_v0 }
  0x6e   :  { %1252 = vmatmul.mubr.f32.vlgmr.msra.gmra.mrb[0].mxu0 %v83_v51  ;;  %1296 = vmatmul.mubr.f32.vlgmr.msra.gmra.mrb[0].mxu1 %v2004_v1  ;;  %v254_v51 = vld [vmem:[#allocation9 + $0x60] sm:$0xff] }
  0x6f   :  { %1645 = vmatpush3.bf16.msra.mxu0 %v2124_v9  ;;  %1254 = vmatprep.mubr.f32.mxu0 %v84_v52  ;;  %v255_v52 = vld [vmem:[#allocation9 + $0x68] sm:$0xff] }
  0x70   :  { %1646 = vmatprep.subr.bf16.mxu0 %v2002_v0  ;;  %1669 = vmatpush3.bf16.msra.mxu1 %v2124_v9 }
  0x71   :  { %1670 = vmatprep.subr.bf16.mxu1 %v2002_v0  ;;  %1365 = vmatprep.mubr.msk.f32.mxu1 %vm2003_vm0, %v2004_v1 }
  0x72   :  { %1255 = vmatmul.mubr.f32.gmra.mrb[2].mxu0 %v85_v53  ;;  %v1835_v53 = vpack.c.bf16 %v255_v52, %v254_v51 }
  0x73   :  { %1648 = vmatpush3.bf16.msra.mxu0 %v2127_v15  ;;  %1257 = vmatprep.mubr.f32.mxu0 %v86_v54  ;;  %v256_v54 = vld [vmem:[#allocation9 + $0x70] sm:$0xff] }
  0x74   :  { %1649 = vmatprep.subr.bf16.mxu0 %v2002_v0  ;;  %1672 = vmatpush3.bf16.msra.mxu1 %v2127_v15 }
  0x75   :  { %1673 = vmatprep.subr.bf16.mxu1 %v2002_v0 }
  0x76   :  { %1258 = vmatmul.mubr.f32.gmra.mrb[4].mxu0 %v87_v55  ;;  %v257_v55 = vld [vmem:[#allocation9 + $0x78] sm:$0xff] }
  0x77   :  { %1651 = vmatpush3.bf16.msra.mxu0 %v2131_v21  ;;  %1260 = vmatprep.mubr.f32.mxu0 %v88_v56  ;;  %v1839_v56 = vpack.c.bf16 %v257_v55, %v256_v54 }
  0x78   :  { %1652 = vmatprep.subr.bf16.mxu0 %v2002_v0  ;;  %1675 = vmatpush3.bf16.msra.mxu1 %v2131_v21 }
  0x79   :  { %1676 = vmatprep.subr.bf16.mxu1 %v2002_v0 }
  0x7a   :  { %1261 = vmatmul.mubr.f32.gmra.mrb[6].mxu0 %v89_v57 }
  0x7b   :  { %1654 = vmatpush3.bf16.msra.mxu0 %v2135_v28  ;;  %1330 = vmatprep.mubr.msk.f32.mxu0 %vm2003_vm0, %v2004_v1 }
  0x7c   :  { %1655 = vmatprep.subr.bf16.mxu0 %v2002_v0  ;;  %1678 = vmatpush3.bf16.msra.mxu1 %v2135_v28 }
  0x7d   :  { %1679 = vmatprep.subr.bf16.mxu1 %v2002_v0 }
  0x7f   :  { %1657 = vmatpush3.bf16.msra.mxu0 %v2139_v34 }
  0x80   :  { %1658 = vmatprep.subr.bf16.mxu0 %v2002_v0  ;;  %1681 = vmatpush3.bf16.msra.mxu1 %v2139_v34 }
  0x81   :  { %1682 = vmatprep.subr.bf16.mxu1 %v2002_v0 }
  0x83   :  { %1660 = vmatpush3.bf16.msra.mxu0 %v2143_v40 }
  0x84   :  { %1661 = vmatprep.subr.bf16.mxu0 %v2002_v0  ;;  %1684 = vmatpush3.bf16.msra.mxu1 %v2143_v40 }
  0x85   :  { %1685 = vmatprep.subr.bf16.mxu1 %v2002_v0 }
  0x87   :  { %1663 = vmatpush3.bf16.msra.mxu0 %v2147_v46 }
  0x88   :  { %1664 = vmatprep.subr.bf16.mxu0 %v2002_v0  ;;  %1687 = vmatpush3.bf16.msra.mxu1 %v2147_v46 }
  0x89   :  { %1688 = vmatprep.subr.bf16.mxu1 %v2002_v0 }
  0x8b   :  { %1666 = vmatpush3.bf16.msra.mxu0 %v2151_v50 }
  0x8c   :  { %1690 = vmatpush3.bf16.msra.mxu1 %v2151_v50  ;;  %1691 = vmatprep.subr.bf16.mxu0 %v2002_v0 }
  0x8d   :  { %1715 = vmatprep.subr.bf16.mxu1 %v2002_v0 }
 0x141   :  { %v1253_v59 = vpop.f32.mrb[0].mxu0  ;;  %v326_v60 = vpop.f32.mrb[0].mxu1 }
 0x142   :  { %v179_v61 = vpop.f32.mrb[1].mxu0  ;;  %v1297_v62 = vpop.f32.mrb[1].mxu1  ;;  %v185_v11 = vadd.f32 %v1253_v59, %v2197_v58 }
 0x143   :  { %v180_v63 = vadd.f32 %v2197_v58, %v179_v61 }
 0x145   :  { %v2200_v2 = vadd.f32 %v326_v60, %v180_v63  ;;  %v2202_v3 = vpop.f32.mrb[2].mxu0  ;;  %v1034_v63 = vld [vmem:[%s2380_s5] ss:$0 sm:$0xff]  ;;  %s2005_s5 = smov [#allocation12]  }
 0x146   :  { %v189_v4 = vpop.f32.mrb[3].mxu0  ;;  %v195_v23 = vadd.f32 %v2202_v3, %v2197_v58  ;;  %s1011_s29 = sshll.u32 %s2005_s5, 4  ;;  %s1012_s29 = int_to_ptr.vmem [resolvable:$true] %s1011_s29 }
 0x147   :  { %v331_v5 = vmax.f32 %v2200_v2, 0.0  ;;  %v190_v17 = vadd.f32 %v2197_v58, %v189_v4  ;;  %s1942_s30 = scalar_lea.vmem %s1012_s29, 128  ;;  %p1947_p5 = scmp.lt.s32.totalorder %s1012_s29, %s1012_s29 }
 0x148   :  { %p1943_p4 = scmp.ne.s32.totalorder %s1012_s29, %s1942_s30  ;;  %p1948_p6 = scmp.lt.s32.totalorder %s1942_s30, %s1942_s30 }
 0x149   :  { %1331 = vmatmul.mubr.f32.vlgmr.msra.gmra.mrb[8].mxu0 %v331_v5  ;;  %v2207_v6 = vpop.f32.mrb[4].mxu0 }
 0x14a   :  { %v2209_v7 = vpop.f32.mrb[5].mxu0  ;;  %1693 = vmatpush3.bf16.msra.mxu0 %v2124_v9  ;;  %1400 = vmatprep.mubr.msk.f32.mxu0 %vm2003_vm0, %v2004_v1  ;;  %p1949_p7 = por %p1948_p6, %p1947_p5 }
 0x14b   :  { %1694 = vmatprep.subr.bf16.mxu0 %v2002_v0  ;;  %v200_v29 = vadd.f32 %v2197_v58, %v2209_v7 }
 0x14c   :  { %p1950_p8 = pnand %p1949_p7, %p1943_p4 }
 0x14d   :  { %v2229_v8 = vpop.f32.mrb[6].mxu0 }
 0x14e   :  { %1696 = vmatpush3.bf16.msra.mxu0 %v2127_v15  ;;  %v2231_v10 = vpop.f32.mrb[7].mxu0 }
 0x14f   :  { %1697 = vmatprep.subr.bf16.mxu0 %v2002_v0  ;;  %v210_v57 = vadd.f32 %v2197_v58, %v2231_v10 }
 0x152   :  { %1699 = vmatpush3.bf16.msra.mxu0 %v2131_v21 }
 0x153   :  { %1700 = vmatprep.subr.bf16.mxu0 %v2002_v0 }
 0x156   :  { %1702 = vmatpush3.bf16.msra.mxu0 %v2135_v28 }
 0x157   :  { %1703 = vmatprep.subr.bf16.mxu0 %v2002_v0 }
 0x15a   :  { %1705 = vmatpush3.bf16.msra.mxu0 %v2139_v34 }
 0x15b   :  { %1706 = vmatprep.subr.bf16.mxu0 %v2002_v0 }
 0x15e   :  { %1708 = vmatpush3.bf16.msra.mxu0 %v2143_v40 }
 0x15f   :  { %1709 = vmatprep.subr.bf16.mxu0 %v2002_v0 }
 0x162   :  { %1711 = vmatpush3.bf16.msra.mxu0 %v2147_v46 }
 0x163   :  { %1712 = vmatprep.subr.bf16.mxu0 %v2002_v0 }
 0x166   :  { %1714 = vmatpush3.bf16.msra.mxu0 %v2151_v50 }
 0x167   :  { %1739 = vmatprep.subr.bf16.mxu0 %v2002_v0 }
 0x21c   :  { %v402_v12 = vpop.f32.mrb[8].mxu0 }
 0x21d   :  { %v2234_v13 = vadd.f32 %v402_v12, %v185_v11  ;;  %v1332_v14 = vpop.f32.mrb[9].mxu0 }
 0x21f   :  { %v407_v16 = vmax.f32 %v2234_v13, 0.0 }
 0x221   :  { %1366 = vmatmul.mubr.f32.vlgmr.msra.gmra.mrb[2].mxu1 %v407_v16 }
 0x222   :  { %1717 = vmatpush3.bf16.msra.mxu1 %v2124_v9  ;;  %1435 = vmatprep.mubr.msk.f32.mxu1 %vm2003_vm0, %v2004_v1 }
 0x223   :  { %1718 = vmatprep.subr.bf16.mxu1 %v2002_v0 }
 0x226   :  { %1720 = vmatpush3.bf16.msra.mxu1 %v2127_v15 }
 0x227   :  { %1721 = vmatprep.subr.bf16.mxu1 %v2002_v0 }
 0x22a   :  { %1723 = vmatpush3.bf16.msra.mxu1 %v2131_v21 }
 0x22b   :  { %1724 = vmatprep.subr.bf16.mxu1 %v2002_v0 }
 0x22e   :  { %1726 = vmatpush3.bf16.msra.mxu1 %v2135_v28 }
 0x22f   :  { %1727 = vmatprep.subr.bf16.mxu1 %v2002_v0 }
 0x232   :  { %1729 = vmatpush3.bf16.msra.mxu1 %v2139_v34 }
 0x233   :  { %1730 = vmatprep.subr.bf16.mxu1 %v2002_v0 }
 0x236   :  { %1732 = vmatpush3.bf16.msra.mxu1 %v2143_v40 }
 0x237   :  { %1733 = vmatprep.subr.bf16.mxu1 %v2002_v0 }
 0x23a   :  { %1735 = vmatpush3.bf16.msra.mxu1 %v2147_v46 }
 0x23b   :  { %1736 = vmatprep.subr.bf16.mxu1 %v2002_v0 }
 0x23e   :  { %1738 = vmatpush3.bf16.msra.mxu1 %v2151_v50 }
 0x23f   :  { %1763 = vmatprep.subr.bf16.mxu1 %v2002_v0 }
 0x2f4   :  { %v478_v18 = vpop.f32.mrb[2].mxu1 }
 0x2f5   :  { %v2258_v19 = vadd.f32 %v478_v18, %v190_v17  ;;  %v1367_v20 = vpop.f32.mrb[3].mxu1  ;;  %v215_v17 = vadd.f32 %v2229_v8, %v2197_v58 }
 0x2f7   :  { %v483_v22 = vmax.f32 %v2258_v19, 0.0 }
 0x2f9   :  { %1401 = vmatmul.mubr.f32.vlgmr.msra.gmra.mrb[10].mxu0 %v483_v22 }
 0x2fa   :  { %1741 = vmatpush3.bf16.msra.mxu0 %v2124_v9  ;;  %1470 = vmatprep.mubr.msk.f32.mxu0 %vm2003_vm0, %v2004_v1 }
 0x2fb   :  { %1742 = vmatprep.subr.bf16.mxu0 %v2002_v0 }
 0x2fe   :  { %1744 = vmatpush3.bf16.msra.mxu0 %v2127_v15 }
 0x2ff   :  { %1745 = vmatprep.subr.bf16.mxu0 %v2002_v0 }
 0x302   :  { %1747 = vmatpush3.bf16.msra.mxu0 %v2131_v21 }
 0x303   :  { %1748 = vmatprep.subr.bf16.mxu0 %v2002_v0 }
 0x306   :  { %1750 = vmatpush3.bf16.msra.mxu0 %v2135_v28 }
 0x307   :  { %1751 = vmatprep.subr.bf16.mxu0 %v2002_v0 }
 0x30a   :  { %1753 = vmatpush3.bf16.msra.mxu0 %v2139_v34 }
 0x30b   :  { %1754 = vmatprep.subr.bf16.mxu0 %v2002_v0 }
 0x30e   :  { %1756 = vmatpush3.bf16.msra.mxu0 %v2143_v40 }
 0x30f   :  { %1757 = vmatprep.subr.bf16.mxu0 %v2002_v0 }
 0x312   :  { %1759 = vmatpush3.bf16.msra.mxu0 %v2147_v46 }
 0x313   :  { %1760 = vmatprep.subr.bf16.mxu0 %v2002_v0 }
 0x316   :  { %1762 = vmatpush3.bf16.msra.mxu0 %v2151_v50 }
 0x317   :  { %1787 = vmatprep.subr.bf16.mxu0 %v2002_v0 }
 0x3cc   :  { %v554_v24 = vpop.f32.mrb[10].mxu0 }
 0x3cd   :  { %v2283_v25 = vadd.f32 %v554_v24, %v195_v23  ;;  %v1402_v26 = vpop.f32.mrb[11].mxu0 }
 0x3cf   :  { %v559_v27 = vmax.f32 %v2283_v25, 0.0 }
 0x3d1   :  { %1436 = vmatmul.mubr.f32.vlgmr.msra.gmra.mrb[4].mxu1 %v559_v27 }
 0x3d2   :  { %1765 = vmatpush3.bf16.msra.mxu1 %v2124_v9  ;;  %1505 = vmatprep.mubr.msk.f32.mxu1 %vm2003_vm0, %v2004_v1 }
 0x3d3   :  { %1766 = vmatprep.subr.bf16.mxu1 %v2002_v0 }
 0x3d6   :  { %1768 = vmatpush3.bf16.msra.mxu1 %v2127_v15 }
 0x3d7   :  { %1769 = vmatprep.subr.bf16.mxu1 %v2002_v0 }
 0x3da   :  { %1771 = vmatpush3.bf16.msra.mxu1 %v2131_v21 }
 0x3db   :  { %1772 = vmatprep.subr.bf16.mxu1 %v2002_v0 }
 0x3de   :  { %1774 = vmatpush3.bf16.msra.mxu1 %v2135_v28 }
 0x3df   :  { %1775 = vmatprep.subr.bf16.mxu1 %v2002_v0 }
 0x3e2   :  { %1777 = vmatpush3.bf16.msra.mxu1 %v2139_v34 }
 0x3e3   :  { %1778 = vmatprep.subr.bf16.mxu1 %v2002_v0 }
 0x3e6   :  { %1780 = vmatpush3.bf16.msra.mxu1 %v2143_v40 }
 0x3e7   :  { %1781 = vmatprep.subr.bf16.mxu1 %v2002_v0 }
 0x3ea   :  { %1783 = vmatpush3.bf16.msra.mxu1 %v2147_v46 }
 0x3eb   :  { %1784 = vmatprep.subr.bf16.mxu1 %v2002_v0 }
 0x3ee   :  { %1786 = vmatpush3.bf16.msra.mxu1 %v2151_v50 }
 0x4a4   :  { %v630_v30 = vpop.f32.mrb[4].mxu1 }
 0x4a5   :  { %v2307_v31 = vadd.f32 %v630_v30, %v200_v29  ;;  %v1437_v32 = vpop.f32.mrb[5].mxu1 }
 0x4a7   :  { %v635_v33 = vmax.f32 %v2307_v31, 0.0 }
 0x4a9   :  { %1471 = vmatmul.mubr.f32.vlgmr.msra.gmra.mrb[12].mxu0 %v635_v33 }
 0x4aa   :  { %1789 = vmatpush3.bf16.msra.mxu0 %v2124_v9  ;;  %1540 = vmatprep.mubr.msk.f32.mxu0 %vm2003_vm0, %v2004_v1  ;;  %v242_v1 = vld [vmem:[#allocation9] sm:$0xff]  ;;  %v243_v9 = vld [vmem:[#allocation9 + $0x8] sm:$0xff] }
 0x4ab   :  { %1790 = vmatprep.subr.bf16.mxu0 %v2002_v0 }
 0x4ae   :  { %1792 = vmatpush3.bf16.msra.mxu0 %v2127_v15  ;;  %v1811_v15 = vpack.c.bf16 %v243_v9, %v242_v1 }
 0x4af   :  { %1793 = vmatprep.subr.bf16.mxu0 %v2002_v0 }
 0x4b0   :  { %1812 = vmatprep.subr.bf16.mxu1 %v1811_v15 }
 0x4b2   :  { %1795 = vmatpush3.bf16.msra.mxu0 %v2131_v21  ;;  %v205_v21 = vadd.f32 %v2207_v6, %v2197_v58 }
 0x4b3   :  { %1796 = vmatprep.subr.bf16.mxu0 %v2002_v0 }
 0x4b6   :  { %1798 = vmatpush3.bf16.msra.mxu0 %v2135_v28 }
 0x4b7   :  { %1799 = vmatprep.subr.bf16.mxu0 %v2002_v0 }
 0x4ba   :  { %1801 = vmatpush3.bf16.msra.mxu0 %v2139_v34  ;;  %v244_v34 = vld [vmem:[#allocation9 + $0x10] sm:$0xff] }
 0x4bb   :  { %1802 = vmatprep.subr.bf16.mxu0 %v2002_v0  ;;  %v1815_v39 = vpack.c.bf16 %v245_v35, %v244_v34 }
 0x4be   :  { %1804 = vmatpush3.bf16.msra.mxu0 %v2143_v40  ;;  %v246_v40 = vld [vmem:[#allocation9 + $0x20] sm:$0xff] }
 0x4bf   :  { %1805 = vmatprep.subr.bf16.mxu0 %v2002_v0 }
 0x4c2   :  { %1807 = vmatpush3.bf16.msra.mxu0 %v2147_v46  ;;  %v251_v46 = vld [vmem:[#allocation9 + $0x48] sm:$0xff] }
 0x4c3   :  { %1808 = vmatprep.subr.bf16.mxu0 %v2002_v0  ;;  %v1819_v0 = vpack.c.bf16 %v247_v41, %v246_v40  ;;  %v1827_v47 = vpack.c.bf16 %v251_v46, %v250_v45 }
 0x4c6   :  { %1810 = vmatpush3.bf16.msra.mxu0 %v2151_v50  ;;  %v1831_v50 = vpack.c.bf16 %v253_v49, %v252_v48 }
 0x57c   :  { %v706_v28 = vpop.f32.mrb[12].mxu0 }
 0x57d   :  { %v710_v36 = vadd.f32 %v706_v28, %v205_v21  ;;  %v1472_v37 = vpop.f32.mrb[13].mxu0 }
 0x57f   :  { %v711_v38 = vmax.f32 %v710_v36, 0.0 }
 0x581   :  { %1506 = vmatmul.mubr.f32.vlgmr.msra.gmra.mrb[6].mxu1 %v711_v38 }
 0x582   :  { %1814 = vmatpush3.bf16.msra.mxu1 %v1811_v15  ;;  %1575 = vmatprep.mubr.f32.mxu1 %v331_v5 }
 0x583   :  { %1816 = vmatprep.subr.bf16.mxu1 %v1815_v39 }
 0x586   :  { %1818 = vmatpush3.bf16.msra.mxu1 %v1815_v39 }
 0x587   :  { %1820 = vmatprep.subr.bf16.mxu1 %v1819_v0 }
 0x58a   :  { %1822 = vmatpush3.bf16.msra.mxu1 %v1819_v0 }
 0x58b   :  { %1824 = vmatprep.subr.bf16.mxu1 %v1823_v44 }
 0x58e   :  { %1826 = vmatpush3.bf16.msra.mxu1 %v1823_v44 }
 0x58f   :  { %1828 = vmatprep.subr.bf16.mxu1 %v1827_v47 }
 0x592   :  { %1830 = vmatpush3.bf16.msra.mxu1 %v1827_v47 }
 0x593   :  { %1832 = vmatprep.subr.bf16.mxu1 %v1831_v50 }
 0x596   :  { %1834 = vmatpush3.bf16.msra.mxu1 %v1831_v50 }
 0x597   :  { %1836 = vmatprep.subr.bf16.mxu1 %v1835_v53 }
 0x59a   :  { %1838 = vmatpush3.bf16.msra.mxu1 %v1835_v53 }
 0x59b   :  { %1840 = vmatprep.subr.bf16.mxu1 %v1839_v56 }
 0x59e   :  { %1842 = vmatpush3.bf16.msra.mxu1 %v1839_v56 }
 0x5a1   :  { %1576 = vmatmul.mubr.f32.vlgmr.msra.gmra.mrb[8].mxu1 %v407_v16 }
 0x5a2   :  { %1578 = vmatprep.mubr.f32.mxu1 %v483_v22 }
 0x5a5   :  { %1579 = vmatmul.mubr.f32.gmra.mrb[10].mxu1 %v559_v27 }
 0x5a6   :  { %1581 = vmatprep.mubr.f32.mxu1 %v635_v33 }
 0x5a9   :  { %1582 = vmatmul.mubr.f32.gmra.mrb[12].mxu1 %v711_v38 }
 0x654   :  { %v782_v59 = vpop.f32.mrb[6].mxu1 }
 0x655   :  { %v786_v60 = vadd.f32 %v782_v59, %v210_v57  ;;  %v1507_v61 = vpop.f32.mrb[7].mxu1 }
 0x657   :  { %v787_v62 = vmax.f32 %v786_v60, 0.0 }
 0x659   :  { %1541 = vmatmul.mubr.f32.vlgmr.msra.gmra.mrb[14].mxu0 %v787_v62  ;;  %1584 = vmatprep.mubr.f32.mxu1 %v787_v62 }
 0x674   :  { %v1577_v2 = vpop.f32.mrb[8].mxu1 }
 0x675   :  { %v951_v3 = vadd.f32 %v1577_v2, %v1034_v63  ;;  %v945_v4 = vpop.f32.mrb[9].mxu1 }
 0x676   :  { %v946_v5 = vadd.f32 %v1034_v63, %v945_v4 }
 0x677   :  { %985 = vst [vmem:[#allocation11 + $0x8] sm:$0xff] %v951_v3 }
 0x678   :  { %984 = vst [vmem:[#allocation11] sm:$0xff] %v946_v5  ;;  %v1580_v6 = vpop.f32.mrb[10].mxu1 }
 0x679   :  { %v961_v7 = vadd.f32 %v1580_v6, %v1034_v63  ;;  %v955_v11 = vpop.f32.mrb[11].mxu1 }
 0x67a   :  { %v956_v10 = vadd.f32 %v1034_v63, %v955_v11 }
 0x67b   :  { %987 = vst [vmem:[#allocation11 + $0x18] sm:$0xff] %v961_v7 }
 0x67c   :  { %986 = vst [vmem:[#allocation11 + $0x10] sm:$0xff] %v956_v10  ;;  %v1583_v12 = vpop.f32.mrb[12].mxu1 }
 0x67d   :  { %v971_v13 = vadd.f32 %v1583_v12, %v1034_v63  ;;  %v965_v14 = vpop.f32.mrb[13].mxu1 }
 0x67e   :  { %v966_v16 = vadd.f32 %v1034_v63, %v965_v14 }
 0x67f   :  { %989 = vst [vmem:[#allocation11 + $0x28] sm:$0xff] %v971_v13 }
 0x680   :  { %988 = vst [vmem:[#allocation11 + $0x20] sm:$0xff] %v966_v16 }
 0x72c   :  { %v858_v18 = vpop.f32.mrb[14].mxu0 }
 0x72d   :  { %v862_v19 = vadd.f32 %v858_v18, %v215_v17  ;;  %v1542_v20 = vpop.f32.mrb[15].mxu0 }
 0x72f   :  { %v863_v22 = vmax.f32 %v862_v19, 0.0 }
 0x731   :  { %992 = vst [vmem:[#allocation12] sm:$0xff] %v863_v22  ;;  %1585 = vmatmul.mubr.f32.gmra.mrb[14].mxu1 %v863_v22 }
 0x732   :  { %1953 = shalt.err (!%p1950_p8)
}
 0x733   :  { %s1954_s10 = scalar_lea.hbm %s2382_s7, 128 }
 0x734   :  { %p1955_p9 = scmp.ne.s32.totalorder %s2382_s7, %s1954_s10  ;;  %p1958_p10 = scmp.lt.u32.totalorder %s1954_s10, %s2382_s7 }
 0x736   :  { %p1960_p11 = pnand %p1958_p10, %p1955_p9 }
 0x738   :  { %1963 = shalt.err (!%p1960_p11)
}
 0x739   :  { %1014 = dma.vmem_to_hbm [thread:$0]  %s1012_s29, 128, %s2382_s7, [#allocation13]  }
 0x73a   :  { %s2006_s17 = smov [#allocation11]  }
 0x73b   :  { %s998_s18 = sshll.u32 %s2006_s17, 4  ;;  %s999_s18 = int_to_ptr.vmem [resolvable:$true] %s998_s18 }
 0x73c   :  { %s1964_s19 = scalar_lea.vmem %s999_s18, 1024  ;;  %p1969_p13 = scmp.lt.s32.totalorder %s999_s18, %s999_s18 }
 0x73d   :  { %p1965_p12 = scmp.ne.s32.totalorder %s999_s18, %s1964_s19  ;;  %p1970_p0 = scmp.lt.s32.totalorder %s1964_s19, %s1964_s19 }
 0x73f   :  { %p1971_p1 = por %p1970_p0, %p1969_p13 }
 0x741   :  { %p1972_p2 = pnand %p1971_p1, %p1965_p12 }
 0x804   :  { %v1586_v58 = vpop.f32.mrb[14].mxu1 }
 0x805   :  { %v981_v8 = vadd.f32 %v1586_v58, %v1034_v63  ;;  %v975_v23 = vpop.f32.mrb[15].mxu1 }
 0x806   :  { %v976_v24 = vadd.f32 %v1034_v63, %v975_v23 }
 0x807   :  { %991 = vst [vmem:[#allocation11 + $0x38] sm:$0xff] %v981_v8 }
 0x808   :  { %990 = vst [vmem:[#allocation11 + $0x30] sm:$0xff] %v976_v24 }
 0x809   :  { %1975 = shalt.err (!%p1972_p2)
}
 0x80a   :  { %s1976_s7 = scalar_lea.hbm %s2381_s6, 1024 }
 0x80b   :  { %p1977_p3 = scmp.ne.s32.totalorder %s2381_s6, %s1976_s7  ;;  %p1980_p4 = scmp.lt.u32.totalorder %s1976_s7, %s2381_s6 }
 0x80d   :  { %p1982_p5 = pnand %p1980_p4, %p1977_p3 }
 0x80f   :  { %1985 = shalt.err (!%p1982_p5)
}
 0x810   :  { %1004 = dma.vmem_to_hbm [thread:$0]  %s999_s18, 1024, %s2381_s6, [#allocation5], %s1998_s13, %s1998_s13, %s1999_s14  }
 0x811   :  { %1992 = dma.done.wait [#allocation5], 1024  }
 0x812   :  { %1993 = vsyncadd [#allocation5], 4294966272 }
 0x813   :  { %1994 = dma.done.wait [#allocation13], 128  }
 0x814   :  { %1995 = vsyncadd [#allocation13], 4294967168 }
 0x815   :  { %1021 = vsyncpa [#allocation4], 1 }
 0x816   :  { %1022 = vsyncpa [#allocation7], 1 }
 0x817   :  { %1023 = vsyncpa [#allocation10], 1 }
 0x818   :  { %1024 = vsyncpa [#allocation5], 1 }
 0x819   :  { %1025 = vsyncpa [#allocation13], 1 }

</bundles_post_ra>
